<compile_context>
chip_gen: v7x
topology: tpu7x:2x2x1
jax: 0.10.0
libtpu: 0.0.40
codegen_flags: <defaults>
</compile_context>

<pallas_src>
import functools

import jax
import jax.numpy as jnp
from jax.experimental import pallas as pl
from jax.experimental.pallas import tpu as pltpu

K_IN = 28 * 28   # 784; left unpadded — Mosaic handles lane padding internally.
N_OUT = 10
N_OUT_PAD = 128  # lane-dense output block (unmasked 128-wide stores)


def mlp_kernel(x_ref, w1_ref, b1_ref, w2_ref, b2_ref, w3_ref, b3_ref,
               w4_ref, b4_ref, out_ref):
    # Cast the raw f32 input tile to bf16 on-core (no wrapper HBM round-trip).
    x = x_ref[...].astype(jnp.bfloat16)
    # Layer 1: (TB, 784) @ (784, 512) -> f32 acc, bias+ReLU in f32, bf16 out.
    h = jnp.dot(x, w1_ref[...], preferred_element_type=jnp.float32)
    h = jnp.maximum(h + b1_ref[...], 0.0).astype(jnp.bfloat16)
    # Layer 2: (TB, 512) @ (512, 256)
    h = jnp.dot(h, w2_ref[...], preferred_element_type=jnp.float32)
    h = jnp.maximum(h + b2_ref[...], 0.0).astype(jnp.bfloat16)
    # Layer 3: (TB, 256) @ (256, 128)
    h = jnp.dot(h, w3_ref[...], preferred_element_type=jnp.float32)
    h = jnp.maximum(h + b3_ref[...], 0.0).astype(jnp.bfloat16)
    # Layer 4 (logits, padded to 128 lanes): (TB, 128) @ (128, 128)
    h = jnp.dot(h, w4_ref[...], preferred_element_type=jnp.float32)
    out_ref[...] = (h + b4_ref[...]).astype(out_ref.dtype)


def _round_up(v, m):
    return ((v + m - 1) // m) * m


@functools.partial(jax.jit, static_argnames=("tb",))
def mlp_forward(x, params, tb=512):
    """x: (B, 1, 28, 28) float32 (NCHW). Returns logits (B, 10) float32."""
    w1, b1, w2, b2, w3, b3, w4, b4 = params
    B = x.shape[0]

    # nn.Flatten(): row-major reshape only — no pad, no cast (done in-kernel).
    x_flat = x.reshape(B, K_IN)

    # Weights in bf16 (halves weight HBM traffic; MXU accumulates in f32).
    w1b = w1.astype(jnp.bfloat16)
    w2b = w2.astype(jnp.bfloat16)
    w3b = w3.astype(jnp.bfloat16)
    # Pad final layer to 128 output lanes (lane-dense stores); biases stay f32.
    w4p = jnp.pad(w4, ((0, 0), (0, N_OUT_PAD - N_OUT))).astype(jnp.bfloat16)
    b4p = jnp.pad(b4, ((0, 0), (0, N_OUT_PAD - N_OUT)))

    # Batch tile: multiple of 16 (bf16 activations pack 16 sublanes/vreg),
    # clamped to the batch; tiny batches fall back to the 8-row f32 sublane.
    if B >= 16:
        tb_eff = int(min(tb, _round_up(B, 16)))
    else:
        tb_eff = int(_round_up(B, 8))
    n_tiles = pl.cdiv(B, tb_eff)
    # v7x has 2 TensorCores: if everything fits in one tile, split in two so
    # the ("parallel",) grid axis actually shards across both cores. Costs one
    # extra ~0.35us grid step on single-TC v5e/v6e — negligible.
    if n_tiles < 2 and B >= 64:
        tb_eff = max(16, _round_up(pl.cdiv(B, 2), 16))
        n_tiles = pl.cdiv(B, tb_eff)

    # Weight/bias blocks are the full arrays, resident across the batch grid.
    def full_spec(shape):
        return pl.BlockSpec(shape, lambda i: (0, 0))

    out = pl.pallas_call(
        mlp_kernel,
        out_shape=jax.ShapeDtypeStruct((B, N_OUT_PAD), jnp.float32),
        grid_spec=pltpu.PrefetchScalarGridSpec(
            num_scalar_prefetch=0,
            grid=(n_tiles,),
            in_specs=[
                pl.BlockSpec((tb_eff, K_IN), lambda i: (i, 0)),  # raw f32 x tile
                full_spec(w1b.shape), full_spec(b1.shape),
                full_spec(w2b.shape), full_spec(b2.shape),
                full_spec(w3b.shape), full_spec(b3.shape),
                full_spec(w4p.shape), full_spec(b4p.shape),
            ],
            out_specs=pl.BlockSpec((tb_eff, N_OUT_PAD), lambda i: (i, 0)),
        ),
        compiler_params=pltpu.CompilerParams(
            dimension_semantics=("parallel",)),
    )(x_flat, w1b, b1, w2b, b2, w3b, b3, w4p, b4p)

    # TODO(synk): on v7x, store w1 in fp8 (e4m3) with per-channel scales folded
    # into the ReLU epilogue to cut the dominant weight DMA for small batches.
    # TODO(synk): perf-critical consumers can read the padded (B, 128) buffer
    # directly (lanes 0..9) and skip this extra XLA slice pass.
    return out[:, :N_OUT]


def init_params(key):
    """Deterministic init mimicking PyTorch nn.Linear default:
    uniform(-1/sqrt(fan_in), 1/sqrt(fan_in)). Weights stored as (in, out)."""
    dims = [(28 * 28, 512), (512, 256), (256, 128), (128, 10)]
    params = []
    for (fan_in, fan_out) in dims:
        key, kw, kb = jax.random.split(key, 3)
        bound = 1.0 / jnp.sqrt(fan_in)
        w = jax.random.uniform(kw, (fan_in, fan_out), jnp.float32,
                               minval=-bound, maxval=bound)
        b = jax.random.uniform(kb, (1, fan_out), jnp.float32,
                               minval=-bound, maxval=bound)
        params += [w, b]
    return tuple(params)


def reference_forward(x, params):
    """Pure-JAX reference using the same bf16-weight / f32-accumulate numerics."""
    w1, b1, w2, b2, w3, b3, w4, b4 = params
    h = x.reshape(x.shape[0], -1).astype(jnp.bfloat16)
    h = jnp.dot(h, w1.astype(jnp.bfloat16), preferred_element_type=jnp.float32)
    h = jnp.maximum(h + b1, 0.0).astype(jnp.bfloat16)
    h = jnp.dot(h, w2.astype(jnp.bfloat16), preferred_element_type=jnp.float32)
    h = jnp.maximum(h + b2, 0.0).astype(jnp.bfloat16)
    h = jnp.dot(h, w3.astype(jnp.bfloat16), preferred_element_type=jnp.float32)
    h = jnp.maximum(h + b3, 0.0).astype(jnp.bfloat16)
    h = jnp.dot(h, w4.astype(jnp.bfloat16), preferred_element_type=jnp.float32)
    return h + b4


if __name__ == "__main__":
    key = jax.random.PRNGKey(0)
    key, kx = jax.random.split(key)

    B = 8  # small batch, multiple of the 8-row sublane tile
    x = jax.random.normal(kx, (B, 1, 28, 28), jnp.float32)  # NCHW, MNIST-like

    params = init_params(key)

    logits = mlp_forward(x, params)
    jax.block_until_ready(logits)

    ref = reference_forward(x, params)
    assert logits.shape == (B, 10)
    assert jnp.allclose(logits, ref, atol=2e-2, rtol=2e-2)

    print("KERNEL_OK")
</pallas_src>

<mosaic_0001>
module attributes {stable_mosaic.version = 11 : i64} {
  func.func @mlp_kernel(%arg0: i32, %arg1: memref<8x784xf32, #tpu.memory_space<vmem>>, %arg2: memref<784x512xbf16, #tpu.memory_space<vmem>>, %arg3: memref<1x512xf32, #tpu.memory_space<vmem>>, %arg4: memref<512x256xbf16, #tpu.memory_space<vmem>>, %arg5: memref<1x256xf32, #tpu.memory_space<vmem>>, %arg6: memref<256x128xbf16, #tpu.memory_space<vmem>>, %arg7: memref<1x128xf32, #tpu.memory_space<vmem>>, %arg8: memref<128x128xbf16, #tpu.memory_space<vmem>>, %arg9: memref<1x128xf32, #tpu.memory_space<vmem>>, %arg10: memref<8x128xf32, #tpu.memory_space<vmem>>) attributes {dimension_semantics = [#tpu.dimension_semantics<parallel>], iteration_bounds = array<i64: 1>, scalar_prefetch = 0 : i64, scratch_operands = 0 : i64, tpu.core_type = #tpu.core_type<tc>, window_params = [{transform_indices = @transform_0, window_bounds = array<i64: 8, 784>}, {pipeline_mode = #tpu.pipeline_mode<synchronous>, transform_indices = @transform_1, window_bounds = array<i64: 784, 512>}, {pipeline_mode = #tpu.pipeline_mode<synchronous>, transform_indices = @transform_2, window_bounds = array<i64: 1, 512>}, {pipeline_mode = #tpu.pipeline_mode<synchronous>, transform_indices = @transform_3, window_bounds = array<i64: 512, 256>}, {pipeline_mode = #tpu.pipeline_mode<synchronous>, transform_indices = @transform_4, window_bounds = array<i64: 1, 256>}, {pipeline_mode = #tpu.pipeline_mode<synchronous>, transform_indices = @transform_5, window_bounds = array<i64: 256, 128>}, {pipeline_mode = #tpu.pipeline_mode<synchronous>, transform_indices = @transform_6, window_bounds = array<i64: 1, 128>}, {pipeline_mode = #tpu.pipeline_mode<synchronous>, transform_indices = @transform_7, window_bounds = array<i64: 128, 128>}, {pipeline_mode = #tpu.pipeline_mode<synchronous>, transform_indices = @transform_8, window_bounds = array<i64: 1, 128>}, {transform_indices = @transform_9, window_bounds = array<i64: 8, 128>}]} {
    %c0 = arith.constant 0 : index
    %c0_0 = arith.constant 0 : index
    %0 = vector.load %arg1[%c0, %c0_0] : memref<8x784xf32, #tpu.memory_space<vmem>>, vector<8x784xf32>
    %1 = arith.truncf %0 : vector<8x784xf32> to vector<8x784xbf16>
    %c0_1 = arith.constant 0 : index
    %c0_2 = arith.constant 0 : index
    %2 = vector.load %arg2[%c0_1, %c0_2] : memref<784x512xbf16, #tpu.memory_space<vmem>>, vector<784x512xbf16>
    %cst = arith.constant dense<0.000000e+00> : vector<8x512xf32>
    %3 = tpu.matmul %1, %2, %cst {dimension_numbers = #tpu.dot_dimension_numbers<[1], [0], [0], [1], [0, 0, 1, 1], [], []>} : vector<8x784xbf16>, vector<784x512xbf16>, vector<8x512xf32> -> vector<8x512xf32>
    %c0_3 = arith.constant 0 : index
    %c0_4 = arith.constant 0 : index
    %4 = vector.load %arg3[%c0_3, %c0_4] : memref<1x512xf32, #tpu.memory_space<vmem>>, vector<1x512xf32>
    %5 = vector.broadcast %4 : vector<1x512xf32> to vector<8x512xf32>
    %6 = arith.addf %3, %5 : vector<8x512xf32>
    %cst_5 = arith.constant 0.000000e+00 : f32
    %7 = vector.broadcast %cst_5 : f32 to vector<8x512xf32>
    %8 = arith.maximumf %6, %7 : vector<8x512xf32>
    %9 = arith.truncf %8 : vector<8x512xf32> to vector<8x512xbf16>
    %c0_6 = arith.constant 0 : index
    %c0_7 = arith.constant 0 : index
    %10 = vector.load %arg4[%c0_6, %c0_7] : memref<512x256xbf16, #tpu.memory_space<vmem>>, vector<512x256xbf16>
    %cst_8 = arith.constant dense<0.000000e+00> : vector<8x256xf32>
    %11 = tpu.matmul %9, %10, %cst_8 {dimension_numbers = #tpu.dot_dimension_numbers<[1], [0], [0], [1], [0, 0, 1, 1], [], []>} : vector<8x512xbf16>, vector<512x256xbf16>, vector<8x256xf32> -> vector<8x256xf32>
    %c0_9 = arith.constant 0 : index
    %c0_10 = arith.constant 0 : index
    %12 = vector.load %arg5[%c0_9, %c0_10] : memref<1x256xf32, #tpu.memory_space<vmem>>, vector<1x256xf32>
    %13 = vector.broadcast %12 : vector<1x256xf32> to vector<8x256xf32>
    %14 = arith.addf %11, %13 : vector<8x256xf32>
    %cst_11 = arith.constant 0.000000e+00 : f32
    %15 = vector.broadcast %cst_11 : f32 to vector<8x256xf32>
    %16 = arith.maximumf %14, %15 : vector<8x256xf32>
    %17 = arith.truncf %16 : vector<8x256xf32> to vector<8x256xbf16>
    %c0_12 = arith.constant 0 : index
    %c0_13 = arith.constant 0 : index
    %18 = vector.load %arg6[%c0_12, %c0_13] : memref<256x128xbf16, #tpu.memory_space<vmem>>, vector<256x128xbf16>
    %cst_14 = arith.constant dense<0.000000e+00> : vector<8x128xf32>
    %19 = tpu.matmul %17, %18, %cst_14 {dimension_numbers = #tpu.dot_dimension_numbers<[1], [0], [0], [1], [0, 0, 1, 1], [], []>} : vector<8x256xbf16>, vector<256x128xbf16>, vector<8x128xf32> -> vector<8x128xf32>
    %c0_15 = arith.constant 0 : index
    %c0_16 = arith.constant 0 : index
    %20 = vector.load %arg7[%c0_15, %c0_16] : memref<1x128xf32, #tpu.memory_space<vmem>>, vector<1x128xf32>
    %21 = vector.broadcast %20 : vector<1x128xf32> to vector<8x128xf32>
    %22 = arith.addf %19, %21 : vector<8x128xf32>
    %cst_17 = arith.constant 0.000000e+00 : f32
    %23 = vector.broadcast %cst_17 : f32 to vector<8x128xf32>
    %24 = arith.maximumf %22, %23 : vector<8x128xf32>
    %25 = arith.truncf %24 : vector<8x128xf32> to vector<8x128xbf16>
    %c0_18 = arith.constant 0 : index
    %c0_19 = arith.constant 0 : index
    %26 = vector.load %arg8[%c0_18, %c0_19] : memref<128x128xbf16, #tpu.memory_space<vmem>>, vector<128x128xbf16>
    %cst_20 = arith.constant dense<0.000000e+00> : vector<8x128xf32>
    %27 = tpu.matmul %25, %26, %cst_20 {dimension_numbers = #tpu.dot_dimension_numbers<[1], [0], [0], [1], [0, 0, 1, 1], [], []>} : vector<8x128xbf16>, vector<128x128xbf16>, vector<8x128xf32> -> vector<8x128xf32>
    %c0_21 = arith.constant 0 : index
    %c0_22 = arith.constant 0 : index
    %28 = vector.load %arg9[%c0_21, %c0_22] : memref<1x128xf32, #tpu.memory_space<vmem>>, vector<1x128xf32>
    %29 = vector.broadcast %28 : vector<1x128xf32> to vector<8x128xf32>
    %30 = arith.addf %27, %29 : vector<8x128xf32>
    %c0_23 = arith.constant 0 : index
    %c0_24 = arith.constant 0 : index
    %31 = vector.load %arg10[%c0_23, %c0_24] : memref<8x128xf32, #tpu.memory_space<vmem>>, vector<8x128xf32>
    tpu.vector_store %arg10[%c0_23, %c0_24], %30 {strides = array<i32>} : memref<8x128xf32, #tpu.memory_space<vmem>>, vector<8x128xf32>,
    return
  }
  func.func @transform_0(%arg0: i32) -> (i32, i32) {
    %c0_i32 = arith.constant 0 : i32
    %c0_i32_0 = arith.constant 0 : i32
    return %arg0, %c0_i32 : i32, i32
  }
  func.func @transform_1(%arg0: i32) -> (i32, i32) {
    %c0_i32 = arith.constant 0 : i32
    %c0_i32_0 = arith.constant 0 : i32
    %c0_i32_1 = arith.constant 0 : i32
    return %c0_i32, %c0_i32_0 : i32, i32
  }
  func.func @transform_2(%arg0: i32) -> (i32, i32) {
    %c0_i32 = arith.constant 0 : i32
    %c0_i32_0 = arith.constant 0 : i32
    %c0_i32_1 = arith.constant 0 : i32
    return %c0_i32, %c0_i32_0 : i32, i32
  }
  func.func @transform_3(%arg0: i32) -> (i32, i32) {
    %c0_i32 = arith.constant 0 : i32
    %c0_i32_0 = arith.constant 0 : i32
    %c0_i32_1 = arith.constant 0 : i32
    return %c0_i32, %c0_i32_0 : i32, i32
  }
  func.func @transform_4(%arg0: i32) -> (i32, i32) {
    %c0_i32 = arith.constant 0 : i32
    %c0_i32_0 = arith.constant 0 : i32
    %c0_i32_1 = arith.constant 0 : i32
    return %c0_i32, %c0_i32_0 : i32, i32
  }
  func.func @transform_5(%arg0: i32) -> (i32, i32) {
    %c0_i32 = arith.constant 0 : i32
    %c0_i32_0 = arith.constant 0 : i32
    %c0_i32_1 = arith.constant 0 : i32
    return %c0_i32, %c0_i32_0 : i32, i32
  }
  func.func @transform_6(%arg0: i32) -> (i32, i32) {
    %c0_i32 = arith.constant 0 : i32
    %c0_i32_0 = arith.constant 0 : i32
    %c0_i32_1 = arith.constant 0 : i32
    return %c0_i32, %c0_i32_0 : i32, i32
  }
  func.func @transform_7(%arg0: i32) -> (i32, i32) {
    %c0_i32 = arith.constant 0 : i32
    %c0_i32_0 = arith.constant 0 : i32
    %c0_i32_1 = arith.constant 0 : i32
    return %c0_i32, %c0_i32_0 : i32, i32
  }
  func.func @transform_8(%arg0: i32) -> (i32, i32) {
    %c0_i32 = arith.constant 0 : i32
    %c0_i32_0 = arith.constant 0 : i32
    %c0_i32_1 = arith.constant 0 : i32
    return %c0_i32, %c0_i32_0 : i32, i32
  }
  func.func @transform_9(%arg0: i32) -> (i32, i32) {
    %c0_i32 = arith.constant 0 : i32
    %c0_i32_0 = arith.constant 0 : i32
    return %arg0, %c0_i32 : i32, i32
  }
}

</mosaic_0001>

<bundles_post_ra>
// kernel: mlp_forward.1
= control target key start
LH: loop header
LB: loop body
LE: loop exit
PB: predicated region body
PF: predicated region fallthrough
CT: control target
= control target key end

     0   :  { %v3184_v2 = vmov 0   ;;  %vm1246_vm0 = vcmask 130048   ;;  %s4169_s0 = inlined_call_operand.vmem [shape: f32[8,784], index: 0, kind: input, shape index: {}]   ;;  %s4170_s1 = inlined_call_operand.vmem [shape: bf16[784,512], index: 1, kind: input, shape index: {}]   ;;  %s4171_s2 = inlined_call_operand.vmem [shape: f32[1,512], index: 2, kind: input, shape index: {}]   ;;  %s4172_s3 = inlined_call_operand.vmem [shape: bf16[512,256], index: 3, kind: input, shape index: {}]   ;;  %s4173_s4 = inlined_call_operand.vmem [shape: f32[1,256], index: 4, kind: input, shape index: {}]   ;;  %s4174_s5 = inlined_call_operand.vmem [shape: bf16[256,128], index: 5, kind: input, shape index: {}]   ;;  %s4175_s6 = inlined_call_operand.vmem [shape: f32[1,128], index: 6, kind: input, shape index: {}]   ;;  %s4176_s7 = inlined_call_operand.vmem [shape: bf16[128,128], index: 7, kind: input, shape index: {}]   ;;  %s4177_s8 = inlined_call_operand.vmem [shape: f32[1,128], index: 8, kind: input, shape index: {}]   ;;  %s4178_s9 = inlined_call_operand.hbm [shape: f32[8,128], index: 9, kind: output, shape index: {}]  }
   0x1   :  { %v2746_v0 = vld [vmem:[%s4170_s1 + $0x4] ss:$16 sps:$4 sm:$0xff]   ;;  %1405 = vmatprep.mubr.bf16.mxu1 %v3184_v2  ;;  %v2750_v3 = vld [vmem:[%s4170_s1] ss:$16 sps:$4 sm:$0xff]   ;;  %v2754_v6 = vld [vmem:[%s4170_s1 + $0x8] ss:$16 sps:$4 sm:$0xff]  }
   0x2   :  { %v2748_v1 = vld [vmem:[%s4170_s1 + $0x604] ss:$16 sps:$4 sm:$0xff]   ;;  %1250 = vmatprep.subr.bf16.mxu0 %v2746_v0  ;;  %v2751_v4 = vld [vmem:[%s4170_s1 + $0x600] ss:$16 sps:$4 sm:$0xff]   ;;  %v2756_v7 = vld [vmem:[%s4170_s1 + $0xc] ss:$16 sps:$4 sm:$0xff]  }
   0x3   :  { %1373 = vmatprep.subr.bf16.mxu1 %v2748_v1  ;;  %v2752_v5 = vld [vmem:[%s4170_s1 + $0x24] ss:$16 sps:$4 sm:$0xff]   ;;  %1251 = vmatpush1.bf16.msra.mxu0 %v2750_v3  ;;  %v2757_v8 = vld [vmem:[%s4170_s1 + $0x20] ss:$16 sps:$4 sm:$0xff]   ;;  %v2760_v12 = vld [vmem:[%s4170_s1 + $0x28] ss:$16 sps:$4 sm:$0xff]  }
   0x4   :  { %1374 = vmatpush1.bf16.msra.mxu1 %v2751_v4  ;;  %1252 = vmatprep.subr.bf16.mxu0 %v2752_v5  ;;  %v40_v9 = vld [vmem:[%s4169_s0 + $0x30] sm:$0xff]  ;;  %v2762_v13 = vld [vmem:[%s4170_s1 + $0x2c] ss:$16 sps:$4 sm:$0xff]   ;;  %v2766_v18 = vld [vmem:[%s4170_s1 + $0x48] ss:$16 sps:$4 sm:$0xff]  }
   0x5   :  { %1414 = vmatprep.subr.bf16.mxu1 %v2756_v7  ;;  %v3266_v10 = vpack.c.bf16 %v40_v9, %v40_v9  ;;  %v2758_v11 = vld [vmem:[%s4170_s1 + $0x44] ss:$16 sps:$4 sm:$0xff]   ;;  %v2763_v14 = vld [vmem:[%s4170_s1 + $0x40] ss:$16 sps:$4 sm:$0xff]   ;;  %v2768_v16 = vld [vmem:[%s4170_s1 + $0x4c] ss:$16 sps:$4 sm:$0xff]  }
   0x6   :  { %v2764_v15 = vld [vmem:[%s4170_s1 + $0x64] ss:$16 sps:$4 sm:$0xff]   ;;  %v2769_v17 = vld [vmem:[%s4170_s1 + $0x60] ss:$16 sps:$4 sm:$0xff]   ;;  %v2774_v20 = vld [vmem:[%s4170_s1 + $0x6c] ss:$16 sps:$4 sm:$0xff]  }
   0x7   :  { %1253 = vmatpush1.bf16.msra.mxu0 %v2757_v8  ;;  %2567 = vmatmul.mubr.msk.bf16.vlgmr.msra.gmra.mrb[0].mxu1 %vm1246_vm0, %v3266_v10  ;;  %v2770_v19 = vld [vmem:[%s4170_s1 + $0x84] ss:$16 sps:$4 sm:$0xff]   ;;  %v2772_v21 = vld [vmem:[%s4170_s1 + $0x68] ss:$16 sps:$4 sm:$0xff]   ;;  %v2775_v22 = vld [vmem:[%s4170_s1 + $0x80] ss:$16 sps:$4 sm:$0xff]  }
   0x8   :  { %1415 = vmatpush1.bf16.msra.mxu1 %v2754_v6  ;;  %1254 = vmatprep.subr.bf16.mxu0 %v2758_v11  ;;  %v2776_v23 = vld [vmem:[%s4170_s1 + $0xa4] ss:$16 sps:$4 sm:$0xff]   ;;  %v2780_v24 = vld [vmem:[%s4170_s1 + $0x8c] ss:$16 sps:$4 sm:$0xff]   ;;  %v2781_v25 = vld [vmem:[%s4170_s1 + $0xa0] ss:$16 sps:$4 sm:$0xff]  }
   0x9   :  { %1416 = vmatprep.subr.bf16.mxu1 %v2762_v13  ;;  %v2778_v26 = vld [vmem:[%s4170_s1 + $0x88] ss:$16 sps:$4 sm:$0xff]   ;;  %v2782_v27 = vld [vmem:[%s4170_s1 + $0xc4] ss:$16 sps:$4 sm:$0xff]   ;;  %v2786_v28 = vld [vmem:[%s4170_s1 + $0xac] ss:$16 sps:$4 sm:$0xff]  }
   0xa   :  { %v2784_v29 = vld [vmem:[%s4170_s1 + $0xa8] ss:$16 sps:$4 sm:$0xff]   ;;  %v2787_v30 = vld [vmem:[%s4170_s1 + $0xc0] ss:$16 sps:$4 sm:$0xff]   ;;  %v2788_v31 = vld [vmem:[%s4170_s1 + $0xe4] ss:$16 sps:$4 sm:$0xff]  }
   0xb   :  { %1255 = vmatpush1.bf16.msra.mxu0 %v2763_v14  ;;  %v2792_v32 = vld [vmem:[%s4170_s1 + $0xcc] ss:$16 sps:$4 sm:$0xff]   ;;  %v2793_v33 = vld [vmem:[%s4170_s1 + $0xe0] ss:$16 sps:$4 sm:$0xff]   ;;  %v2790_v34 = vld [vmem:[%s4170_s1 + $0xc8] ss:$16 sps:$4 sm:$0xff]  }
   0xc   :  { %1417 = vmatpush1.bf16.msra.mxu1 %v2760_v12  ;;  %1256 = vmatprep.subr.bf16.mxu0 %v2764_v15  ;;  %v2794_v35 = vld [vmem:[%s4170_s1 + $0x104] ss:$16 sps:$4 sm:$0xff]   ;;  %v2798_v36 = vld [vmem:[%s4170_s1 + $0xec] ss:$16 sps:$4 sm:$0xff]   ;;  %v2796_v37 = vld [vmem:[%s4170_s1 + $0xe8] ss:$16 sps:$4 sm:$0xff]  }
   0xd   :  { %1418 = vmatprep.subr.bf16.mxu1 %v2768_v16  ;;  %v2799_v38 = vld [vmem:[%s4170_s1 + $0x100] ss:$16 sps:$4 sm:$0xff]   ;;  %v2800_v39 = vld [vmem:[%s4170_s1 + $0x124] ss:$16 sps:$4 sm:$0xff]   ;;  %v2804_v40 = vld [vmem:[%s4170_s1 + $0x10c] ss:$16 sps:$4 sm:$0xff]  }
   0xe   :  { %v2805_v41 = vld [vmem:[%s4170_s1 + $0x120] ss:$16 sps:$4 sm:$0xff]   ;;  %v2802_v42 = vld [vmem:[%s4170_s1 + $0x108] ss:$16 sps:$4 sm:$0xff]   ;;  %v2806_v43 = vld [vmem:[%s4170_s1 + $0x144] ss:$16 sps:$4 sm:$0xff]  }
   0xf   :  { %1257 = vmatpush1.bf16.msra.mxu0 %v2769_v17  ;;  %v2810_v44 = vld [vmem:[%s4170_s1 + $0x12c] ss:$16 sps:$4 sm:$0xff]   ;;  %v2808_v45 = vld [vmem:[%s4170_s1 + $0x128] ss:$16 sps:$4 sm:$0xff]   ;;  %v2811_v46 = vld [vmem:[%s4170_s1 + $0x140] ss:$16 sps:$4 sm:$0xff]  }
  0x10   :  { %1419 = vmatpush1.bf16.msra.mxu1 %v2766_v18  ;;  %1258 = vmatprep.subr.bf16.mxu0 %v2770_v19  ;;  %v2812_v47 = vld [vmem:[%s4170_s1 + $0x164] ss:$16 sps:$4 sm:$0xff]   ;;  %v2816_v48 = vld [vmem:[%s4170_s1 + $0x14c] ss:$16 sps:$4 sm:$0xff]   ;;  %v2817_v50 = vld [vmem:[%s4170_s1 + $0x160] ss:$16 sps:$4 sm:$0xff]  }
  0x11   :  { %1420 = vmatprep.subr.bf16.mxu1 %v2774_v20  ;;  %v35_v49 = vld [vmem:[%s4169_s0 + $0x8] sm:$0xff]  ;;  %v2818_v53 = vld [vmem:[%s4170_s1 + $0x184] ss:$16 sps:$4 sm:$0xff]   ;;  %v2823_v56 = vld [vmem:[%s4170_s1 + $0x180] ss:$16 sps:$4 sm:$0xff]  }
  0x12   :  { %v42_v51 = vpack.c.bf16 %v35_v49, %v35_v49  ;;  %v2814_v52 = vld [vmem:[%s4170_s1 + $0x148] ss:$16 sps:$4 sm:$0xff]   ;;  %v2822_v54 = vld [vmem:[%s4170_s1 + $0x16c] ss:$16 sps:$4 sm:$0xff]   ;;  %v2824_v57 = vld [vmem:[%s4170_s1 + $0x1a4] ss:$16 sps:$4 sm:$0xff]  }
  0x13   :  { %1259 = vmatpush1.bf16.msra.mxu0 %v2775_v22  ;;  %v2820_v55 = vld [vmem:[%s4170_s1 + $0x168] ss:$16 sps:$4 sm:$0xff]   ;;  %v2828_v58 = vld [vmem:[%s4170_s1 + $0x18c] ss:$16 sps:$4 sm:$0xff]   ;;  %v2829_v60 = vld [vmem:[%s4170_s1 + $0x1a0] ss:$16 sps:$4 sm:$0xff]  }
  0x14   :  { %1421 = vmatpush1.bf16.msra.mxu1 %v2772_v21  ;;  %1260 = vmatprep.subr.bf16.mxu0 %v2776_v23  ;;  %v2826_v59 = vld [vmem:[%s4170_s1 + $0x188] ss:$16 sps:$4 sm:$0xff]   ;;  %v2830_v61 = vld [vmem:[%s4170_s1 + $0x1c4] ss:$16 sps:$4 sm:$0xff]   ;;  %v2834_v62 = vld [vmem:[%s4170_s1 + $0x1ac] ss:$16 sps:$4 sm:$0xff]  }
  0x15   :  { %1422 = vmatprep.subr.bf16.mxu1 %v2780_v24  ;;  %1282 = vmatprep.mubr.bf16.mxu0 %v42_v51  ;;  %v2832_v63 = vld [vmem:[%s4170_s1 + $0x1a8] ss:$16 sps:$4 sm:$0xff]   ;;  %v2835_v0 = vld [vmem:[%s4170_s1 + $0x1c0] ss:$16 sps:$4 sm:$0xff]   ;;  %v2836_v1 = vld [vmem:[%s4170_s1 + $0x1e4] ss:$16 sps:$4 sm:$0xff]  }
  0x16   :  { %1446 = vmatprep.mubr.bf16.mxu1 %v42_v51  ;;  %v2840_v3 = vld [vmem:[%s4170_s1 + $0x1cc] ss:$16 sps:$4 sm:$0xff]   ;;  %v2838_v4 = vld [vmem:[%s4170_s1 + $0x1c8] ss:$16 sps:$4 sm:$0xff]   ;;  %v2841_v5 = vld [vmem:[%s4170_s1 + $0x1e0] ss:$16 sps:$4 sm:$0xff]  }
  0x17   :  { %1261 = vmatpush1.bf16.msra.mxu0 %v2781_v25  ;;  %v34_v6 = vld [vmem:[%s4169_s0] sm:$0xff]  ;;  %v2847_v8 = vld [vmem:[%s4170_s1 + $0x1ec] ss:$16 sps:$4 sm:$0xff]   ;;  %v2845_v12 = vld [vmem:[%s4170_s1 + $0x1e8] ss:$16 sps:$4 sm:$0xff]  }
  0x18   :  { %1423 = vmatpush1.bf16.msra.mxu1 %v2778_v26  ;;  %1262 = vmatprep.subr.bf16.mxu0 %v2782_v27  ;;  %v2844_v7 = vld [vmem:[%s4170_s1 + $0x204] ss:$16 sps:$4 sm:$0xff]   ;;  %v41_v9 = vpack.c.bf16 %v34_v6, %v34_v6  ;;  %v2842_v11 = vld [vmem:[%s4170_s1 + $0x200] ss:$16 sps:$4 sm:$0xff]   ;;  %v2853_v14 = vld [vmem:[%s4170_s1 + $0x20c] ss:$16 sps:$4 sm:$0xff]  }
  0x19   :  { %1424 = vmatprep.subr.bf16.mxu1 %v2786_v28  ;;  %v2850_v13 = vld [vmem:[%s4170_s1 + $0x224] ss:$16 sps:$4 sm:$0xff]   ;;  %v2848_v15 = vld [vmem:[%s4170_s1 + $0x220] ss:$16 sps:$4 sm:$0xff]   ;;  %v2851_v16 = vld [vmem:[%s4170_s1 + $0x208] ss:$16 sps:$4 sm:$0xff]  }
  0x1a   :  { %v2856_v17 = vld [vmem:[%s4170_s1 + $0x244] ss:$16 sps:$4 sm:$0xff]   ;;  %v2859_v18 = vld [vmem:[%s4170_s1 + $0x22c] ss:$16 sps:$4 sm:$0xff]   ;;  %v2854_v19 = vld [vmem:[%s4170_s1 + $0x240] ss:$16 sps:$4 sm:$0xff]  }
  0x1b   :  { %1263 = vmatpush1.bf16.msra.mxu0 %v2787_v30  ;;  %v2857_v20 = vld [vmem:[%s4170_s1 + $0x228] ss:$16 sps:$4 sm:$0xff]   ;;  %v2862_v21 = vld [vmem:[%s4170_s1 + $0x264] ss:$16 sps:$4 sm:$0xff]   ;;  %v2865_v22 = vld [vmem:[%s4170_s1 + $0x24c] ss:$16 sps:$4 sm:$0xff]  }
  0x1c   :  { %1425 = vmatpush1.bf16.msra.mxu1 %v2784_v29  ;;  %1264 = vmatprep.subr.bf16.mxu0 %v2788_v31  ;;  %v2860_v23 = vld [vmem:[%s4170_s1 + $0x260] ss:$16 sps:$4 sm:$0xff]   ;;  %v2863_v24 = vld [vmem:[%s4170_s1 + $0x248] ss:$16 sps:$4 sm:$0xff]   ;;  %v2868_v25 = vld [vmem:[%s4170_s1 + $0x284] ss:$16 sps:$4 sm:$0xff]  }
  0x1d   :  { %1426 = vmatprep.subr.bf16.mxu1 %v2792_v32  ;;  %v2871_v26 = vld [vmem:[%s4170_s1 + $0x26c] ss:$16 sps:$4 sm:$0xff]   ;;  %v2866_v27 = vld [vmem:[%s4170_s1 + $0x280] ss:$16 sps:$4 sm:$0xff]   ;;  %v2869_v28 = vld [vmem:[%s4170_s1 + $0x268] ss:$16 sps:$4 sm:$0xff]  }
  0x1e   :  { %v2874_v29 = vld [vmem:[%s4170_s1 + $0x2a4] ss:$16 sps:$4 sm:$0xff]   ;;  %v2877_v30 = vld [vmem:[%s4170_s1 + $0x28c] ss:$16 sps:$4 sm:$0xff]   ;;  %v2872_v31 = vld [vmem:[%s4170_s1 + $0x2a0] ss:$16 sps:$4 sm:$0xff]  }
  0x1f   :  { %1265 = vmatpush1.bf16.msra.mxu0 %v2793_v33  ;;  %v2875_v32 = vld [vmem:[%s4170_s1 + $0x288] ss:$16 sps:$4 sm:$0xff]   ;;  %v2880_v33 = vld [vmem:[%s4170_s1 + $0x2c4] ss:$16 sps:$4 sm:$0xff]   ;;  %v2896_v49 = vld [vmem:[%s4170_s1 + $0x320] ss:$16 sps:$4 sm:$0xff]  }
  0x20   :  { %1427 = vmatpush1.bf16.msra.mxu1 %v2790_v34  ;;  %1266 = vmatprep.subr.bf16.mxu0 %v2794_v35  ;;  %v2883_v34 = vld [vmem:[%s4170_s1 + $0x2ac] ss:$16 sps:$4 sm:$0xff]   ;;  %v2904_v51 = vld [vmem:[%s4170_s1 + $0x344] ss:$16 sps:$4 sm:$0xff]   ;;  %v2926_v6 = vld [vmem:[%s4170_s1 + $0x3c0] ss:$16 sps:$4 sm:$0xff]  }
  0x21   :  { %1428 = vmatprep.subr.bf16.mxu1 %v2798_v36  ;;  %v37_v35 = vld [vmem:[%s4169_s0 + $0x18] sm:$0xff] }
  0x22   :  { %v44_v36 = vpack.c.bf16 %v37_v35, %v37_v35  ;;  %v2962_v35 = vld [vmem:[%s4170_s1 + $0x480] ss:$16 sps:$4 sm:$0xff]  }
  0x23   :  { %1267 = vmatpush1.bf16.msra.mxu0 %v2799_v38  ;;  %v2881_v38 = vld [vmem:[%s4170_s1 + $0x2a8] ss:$16 sps:$4 sm:$0xff]  }
  0x24   :  { %1429 = vmatpush1.bf16.msra.mxu1 %v2796_v37  ;;  %1268 = vmatprep.subr.bf16.mxu0 %v2800_v39  ;;  %v2878_v37 = vld [vmem:[%s4170_s1 + $0x2c0] ss:$16 sps:$4 sm:$0xff]   ;;  %v2886_v39 = vld [vmem:[%s4170_s1 + $0x2e4] ss:$16 sps:$4 sm:$0xff]  }
  0x25   :  { %1430 = vmatprep.subr.bf16.mxu1 %v2804_v40  ;;  %v2889_v40 = vld [vmem:[%s4170_s1 + $0x2cc] ss:$16 sps:$4 sm:$0xff]  }
  0x27   :  { %1269 = vmatpush1.bf16.msra.mxu0 %v2805_v41  ;;  %v2884_v41 = vld [vmem:[%s4170_s1 + $0x2e0] ss:$16 sps:$4 sm:$0xff]  }
  0x28   :  { %1431 = vmatpush1.bf16.msra.mxu1 %v2802_v42  ;;  %1270 = vmatprep.subr.bf16.mxu0 %v2806_v43  ;;  %v2887_v42 = vld [vmem:[%s4170_s1 + $0x2c8] ss:$16 sps:$4 sm:$0xff]   ;;  %v2892_v43 = vld [vmem:[%s4170_s1 + $0x304] ss:$16 sps:$4 sm:$0xff]  }
  0x29   :  { %1432 = vmatprep.subr.bf16.mxu1 %v2810_v44  ;;  %v2895_v44 = vld [vmem:[%s4170_s1 + $0x2ec] ss:$16 sps:$4 sm:$0xff]  }
  0x2b   :  { %1271 = vmatpush1.bf16.msra.mxu0 %v2811_v46  ;;  %v2893_v46 = vld [vmem:[%s4170_s1 + $0x2e8] ss:$16 sps:$4 sm:$0xff]  }
  0x2c   :  { %1433 = vmatpush1.bf16.msra.mxu1 %v2808_v45  ;;  %1272 = vmatprep.subr.bf16.mxu0 %v2812_v47  ;;  %v2890_v45 = vld [vmem:[%s4170_s1 + $0x300] ss:$16 sps:$4 sm:$0xff]   ;;  %v2898_v47 = vld [vmem:[%s4170_s1 + $0x324] ss:$16 sps:$4 sm:$0xff]  }
  0x2d   :  { %1434 = vmatprep.subr.bf16.mxu1 %v2816_v48  ;;  %v2901_v48 = vld [vmem:[%s4170_s1 + $0x30c] ss:$16 sps:$4 sm:$0xff]  }
  0x2f   :  { %1273 = vmatpush1.bf16.msra.mxu0 %v2817_v50  ;;  %v2899_v50 = vld [vmem:[%s4170_s1 + $0x308] ss:$16 sps:$4 sm:$0xff]  }
  0x30   :  { %1435 = vmatpush1.bf16.msra.mxu1 %v2814_v52  ;;  %1274 = vmatprep.subr.bf16.mxu0 %v2818_v53  ;;  %v2907_v52 = vld [vmem:[%s4170_s1 + $0x32c] ss:$16 sps:$4 sm:$0xff]   ;;  %v2902_v53 = vld [vmem:[%s4170_s1 + $0x340] ss:$16 sps:$4 sm:$0xff]  }
  0x31   :  { %1436 = vmatprep.subr.bf16.mxu1 %v2822_v54  ;;  %v2905_v54 = vld [vmem:[%s4170_s1 + $0x328] ss:$16 sps:$4 sm:$0xff]  }
  0x33   :  { %1275 = vmatpush1.bf16.msra.mxu0 %v2823_v56  ;;  %v2913_v56 = vld [vmem:[%s4170_s1 + $0x34c] ss:$16 sps:$4 sm:$0xff]  }
  0x34   :  { %1437 = vmatpush1.bf16.msra.mxu1 %v2820_v55  ;;  %1276 = vmatprep.subr.bf16.mxu0 %v2824_v57  ;;  %v2910_v55 = vld [vmem:[%s4170_s1 + $0x364] ss:$16 sps:$4 sm:$0xff]   ;;  %v2908_v57 = vld [vmem:[%s4170_s1 + $0x360] ss:$16 sps:$4 sm:$0xff]  }
  0x35   :  { %1438 = vmatprep.subr.bf16.mxu1 %v2828_v58  ;;  %v2911_v58 = vld [vmem:[%s4170_s1 + $0x348] ss:$16 sps:$4 sm:$0xff]  }
  0x37   :  { %1277 = vmatpush1.bf16.msra.mxu0 %v2829_v60  ;;  %v2919_v60 = vld [vmem:[%s4170_s1 + $0x36c] ss:$16 sps:$4 sm:$0xff]  }
  0x38   :  { %1439 = vmatpush1.bf16.msra.mxu1 %v2826_v59  ;;  %1278 = vmatprep.subr.bf16.mxu0 %v2830_v61  ;;  %v2916_v59 = vld [vmem:[%s4170_s1 + $0x384] ss:$16 sps:$4 sm:$0xff]   ;;  %v2914_v61 = vld [vmem:[%s4170_s1 + $0x380] ss:$16 sps:$4 sm:$0xff]  }
  0x39   :  { %1440 = vmatprep.subr.bf16.mxu1 %v2834_v62  ;;  %v2917_v62 = vld [vmem:[%s4170_s1 + $0x368] ss:$16 sps:$4 sm:$0xff]  }
  0x3b   :  { %1279 = vmatpush1.bf16.msra.mxu0 %v2835_v0  ;;  %v2925_v0 = vld [vmem:[%s4170_s1 + $0x38c] ss:$16 sps:$4 sm:$0xff]  }
  0x3c   :  { %1441 = vmatpush1.bf16.msra.mxu1 %v2832_v63  ;;  %1280 = vmatprep.subr.bf16.mxu0 %v2836_v1  ;;  %v2922_v63 = vld [vmem:[%s4170_s1 + $0x3a4] ss:$16 sps:$4 sm:$0xff]   ;;  %v2920_v1 = vld [vmem:[%s4170_s1 + $0x3a0] ss:$16 sps:$4 sm:$0xff]  }
  0x3d   :  { %1442 = vmatprep.subr.bf16.mxu1 %v2840_v3  ;;  %v2923_v3 = vld [vmem:[%s4170_s1 + $0x388] ss:$16 sps:$4 sm:$0xff]  }
  0x3f   :  { %1281 = vmatpush1.bf16.msra.mxu0 %v2841_v5  ;;  %v2931_v5 = vld [vmem:[%s4170_s1 + $0x3ac] ss:$16 sps:$4 sm:$0xff]  }
  0x40   :  { %1443 = vmatpush1.bf16.msra.mxu1 %v2838_v4  ;;  %1291 = vmatprep.subr.bf16.mxu0 %v2844_v7  ;;  %v2928_v4 = vld [vmem:[%s4170_s1 + $0x3c4] ss:$16 sps:$4 sm:$0xff]   ;;  %v2929_v7 = vld [vmem:[%s4170_s1 + $0x3a8] ss:$16 sps:$4 sm:$0xff]  }
  0x41   :  { %1444 = vmatprep.subr.bf16.mxu1 %v2847_v8  ;;  %v2934_v8 = vld [vmem:[%s4170_s1 + $0x3e4] ss:$16 sps:$4 sm:$0xff]  }
  0x42   :  { %1283 = vmatmul.mubr.bf16.vlgmr.msra.gmra.mrb[0].mxu0 %v41_v9 }
  0x43   :  { %1292 = vmatpush1.bf16.msra.mxu0 %v2842_v11  ;;  %1323 = vmatprep.mubr.bf16.mxu0 %v44_v36  ;;  %v2932_v11 = vld [vmem:[%s4170_s1 + $0x3e0] ss:$16 sps:$4 sm:$0xff]  }
  0x44   :  { %1445 = vmatpush1.bf16.msra.mxu1 %v2845_v12  ;;  %1293 = vmatprep.subr.bf16.mxu0 %v2850_v13  ;;  %v36_v12 = vld [vmem:[%s4169_s0 + $0x10] sm:$0xff]  ;;  %v2935_v13 = vld [vmem:[%s4170_s1 + $0x3c8] ss:$16 sps:$4 sm:$0xff]  }
  0x45   :  { %1455 = vmatprep.subr.bf16.mxu1 %v2853_v14  ;;  %v2940_v14 = vld [vmem:[%s4170_s1 + $0x404] ss:$16 sps:$4 sm:$0xff]  }
  0x47   :  { %1294 = vmatpush1.bf16.msra.mxu0 %v2848_v15  ;;  %1447 = vmatmul.mubr.bf16.vlgmr.msra.gmra.mrb[4].mxu1 %v41_v9  ;;  %v2937_v9 = vld [vmem:[%s4170_s1 + $0x3cc] ss:$16 sps:$4 sm:$0xff]  }
  0x48   :  { %1456 = vmatpush1.bf16.msra.mxu1 %v2851_v16  ;;  %1295 = vmatprep.subr.bf16.mxu0 %v2856_v17  ;;  %v2943_v15 = vld [vmem:[%s4170_s1 + $0x3ec] ss:$16 sps:$4 sm:$0xff]   ;;  %v43_v16 = vpack.c.bf16 %v36_v12, %v36_v12  ;;  %v2938_v17 = vld [vmem:[%s4170_s1 + $0x400] ss:$16 sps:$4 sm:$0xff]  }
  0x49   :  { %1457 = vmatprep.subr.bf16.mxu1 %v2859_v18  ;;  %1487 = vmatprep.mubr.bf16.mxu1 %v44_v36  ;;  %v2941_v18 = vld [vmem:[%s4170_s1 + $0x3e8] ss:$16 sps:$4 sm:$0xff]  }
  0x4a   :  { %v2965_v36 = vld [vmem:[%s4170_s1 + $0x468] ss:$16 sps:$4 sm:$0xff]  }
  0x4b   :  { %1296 = vmatpush1.bf16.msra.mxu0 %v2854_v19  ;;  %v2946_v19 = vld [vmem:[%s4170_s1 + $0x424] ss:$16 sps:$4 sm:$0xff]  }
  0x4c   :  { %1458 = vmatpush1.bf16.msra.mxu1 %v2857_v20  ;;  %1297 = vmatprep.subr.bf16.mxu0 %v2862_v21  ;;  %v39_v20 = vld [vmem:[%s4169_s0 + $0x28] sm:$0xff] }
  0x4d   :  { %1459 = vmatprep.subr.bf16.mxu1 %v2865_v22  ;;  %v2949_v21 = vld [vmem:[%s4170_s1 + $0x40c] ss:$16 sps:$4 sm:$0xff]   ;;  %v46_v22 = vpack.c.bf16 %v39_v20, %v39_v20 }
  0x4f   :  { %1298 = vmatpush1.bf16.msra.mxu0 %v2860_v23  ;;  %v2944_v23 = vld [vmem:[%s4170_s1 + $0x420] ss:$16 sps:$4 sm:$0xff]  }
  0x50   :  { %1460 = vmatpush1.bf16.msra.mxu1 %v2863_v24  ;;  %1299 = vmatprep.subr.bf16.mxu0 %v2868_v25  ;;  %v2947_v24 = vld [vmem:[%s4170_s1 + $0x408] ss:$16 sps:$4 sm:$0xff]   ;;  %v2952_v25 = vld [vmem:[%s4170_s1 + $0x444] ss:$16 sps:$4 sm:$0xff]  }
  0x51   :  { %1461 = vmatprep.subr.bf16.mxu1 %v2871_v26  ;;  %v2955_v26 = vld [vmem:[%s4170_s1 + $0x42c] ss:$16 sps:$4 sm:$0xff]  }
  0x53   :  { %1300 = vmatpush1.bf16.msra.mxu0 %v2866_v27  ;;  %v2950_v27 = vld [vmem:[%s4170_s1 + $0x440] ss:$16 sps:$4 sm:$0xff]  }
  0x54   :  { %1462 = vmatpush1.bf16.msra.mxu1 %v2869_v28  ;;  %1301 = vmatprep.subr.bf16.mxu0 %v2874_v29  ;;  %v2953_v28 = vld [vmem:[%s4170_s1 + $0x428] ss:$16 sps:$4 sm:$0xff]   ;;  %v2958_v29 = vld [vmem:[%s4170_s1 + $0x464] ss:$16 sps:$4 sm:$0xff]  }
  0x55   :  { %1463 = vmatprep.subr.bf16.mxu1 %v2877_v30  ;;  %v2961_v30 = vld [vmem:[%s4170_s1 + $0x44c] ss:$16 sps:$4 sm:$0xff]  }
  0x57   :  { %1302 = vmatpush1.bf16.msra.mxu0 %v2872_v31  ;;  %v2956_v31 = vld [vmem:[%s4170_s1 + $0x460] ss:$16 sps:$4 sm:$0xff]  }
  0x58   :  { %1464 = vmatpush1.bf16.msra.mxu1 %v2875_v32  ;;  %1303 = vmatprep.subr.bf16.mxu0 %v2880_v33  ;;  %v2959_v32 = vld [vmem:[%s4170_s1 + $0x448] ss:$16 sps:$4 sm:$0xff]   ;;  %v2964_v33 = vld [vmem:[%s4170_s1 + $0x484] ss:$16 sps:$4 sm:$0xff]  }
  0x59   :  { %1465 = vmatprep.subr.bf16.mxu1 %v2883_v34  ;;  %v2967_v34 = vld [vmem:[%s4170_s1 + $0x46c] ss:$16 sps:$4 sm:$0xff]  }
  0x5b   :  { %1304 = vmatpush1.bf16.msra.mxu0 %v2878_v37  ;;  %v2970_v37 = vld [vmem:[%s4170_s1 + $0x4a4] ss:$16 sps:$4 sm:$0xff]  }
  0x5c   :  { %1466 = vmatpush1.bf16.msra.mxu1 %v2881_v38  ;;  %1305 = vmatprep.subr.bf16.mxu0 %v2886_v39  ;;  %v2973_v38 = vld [vmem:[%s4170_s1 + $0x48c] ss:$16 sps:$4 sm:$0xff]   ;;  %v2968_v39 = vld [vmem:[%s4170_s1 + $0x4a0] ss:$16 sps:$4 sm:$0xff]  }
  0x5d   :  { %1467 = vmatprep.subr.bf16.mxu1 %v2889_v40  ;;  %v2971_v40 = vld [vmem:[%s4170_s1 + $0x488] ss:$16 sps:$4 sm:$0xff]  }
  0x5f   :  { %1306 = vmatpush1.bf16.msra.mxu0 %v2884_v41  ;;  %v2976_v41 = vld [vmem:[%s4170_s1 + $0x4c4] ss:$16 sps:$4 sm:$0xff]  }
  0x60   :  { %1468 = vmatpush1.bf16.msra.mxu1 %v2887_v42  ;;  %1307 = vmatprep.subr.bf16.mxu0 %v2892_v43  ;;  %v2979_v42 = vld [vmem:[%s4170_s1 + $0x4ac] ss:$16 sps:$4 sm:$0xff]   ;;  %v2974_v43 = vld [vmem:[%s4170_s1 + $0x4c0] ss:$16 sps:$4 sm:$0xff]  }
  0x61   :  { %1469 = vmatprep.subr.bf16.mxu1 %v2895_v44  ;;  %v2977_v44 = vld [vmem:[%s4170_s1 + $0x4a8] ss:$16 sps:$4 sm:$0xff]  }
  0x63   :  { %1308 = vmatpush1.bf16.msra.mxu0 %v2890_v45  ;;  %v2982_v45 = vld [vmem:[%s4170_s1 + $0x4e4] ss:$16 sps:$4 sm:$0xff]  }
  0x64   :  { %1470 = vmatpush1.bf16.msra.mxu1 %v2893_v46  ;;  %1309 = vmatprep.subr.bf16.mxu0 %v2898_v47  ;;  %v2985_v46 = vld [vmem:[%s4170_s1 + $0x4cc] ss:$16 sps:$4 sm:$0xff]   ;;  %v2980_v47 = vld [vmem:[%s4170_s1 + $0x4e0] ss:$16 sps:$4 sm:$0xff]  }
  0x65   :  { %1471 = vmatprep.subr.bf16.mxu1 %v2901_v48  ;;  %v2983_v48 = vld [vmem:[%s4170_s1 + $0x4c8] ss:$16 sps:$4 sm:$0xff]  }
  0x67   :  { %1310 = vmatpush1.bf16.msra.mxu0 %v2896_v49  ;;  %v2988_v49 = vld [vmem:[%s4170_s1 + $0x504] ss:$16 sps:$4 sm:$0xff]  }
  0x68   :  { %1472 = vmatpush1.bf16.msra.mxu1 %v2899_v50  ;;  %1311 = vmatprep.subr.bf16.mxu0 %v2904_v51  ;;  %v2991_v50 = vld [vmem:[%s4170_s1 + $0x4ec] ss:$16 sps:$4 sm:$0xff]   ;;  %v2986_v51 = vld [vmem:[%s4170_s1 + $0x500] ss:$16 sps:$4 sm:$0xff]  }
  0x69   :  { %1473 = vmatprep.subr.bf16.mxu1 %v2907_v52  ;;  %v2989_v52 = vld [vmem:[%s4170_s1 + $0x4e8] ss:$16 sps:$4 sm:$0xff]  }
  0x6b   :  { %1312 = vmatpush1.bf16.msra.mxu0 %v2902_v53  ;;  %v2994_v53 = vld [vmem:[%s4170_s1 + $0x524] ss:$16 sps:$4 sm:$0xff]  }
  0x6c   :  { %1474 = vmatpush1.bf16.msra.mxu1 %v2905_v54  ;;  %1313 = vmatprep.subr.bf16.mxu0 %v2910_v55  ;;  %v2997_v54 = vld [vmem:[%s4170_s1 + $0x50c] ss:$16 sps:$4 sm:$0xff]   ;;  %v2992_v55 = vld [vmem:[%s4170_s1 + $0x520] ss:$16 sps:$4 sm:$0xff]  }
  0x6d   :  { %1475 = vmatprep.subr.bf16.mxu1 %v2913_v56  ;;  %v2995_v56 = vld [vmem:[%s4170_s1 + $0x508] ss:$16 sps:$4 sm:$0xff]  }
  0x6f   :  { %1314 = vmatpush1.bf16.msra.mxu0 %v2908_v57  ;;  %v3000_v57 = vld [vmem:[%s4170_s1 + $0x544] ss:$16 sps:$4 sm:$0xff]  }
  0x70   :  { %1476 = vmatpush1.bf16.msra.mxu1 %v2911_v58  ;;  %1315 = vmatprep.subr.bf16.mxu0 %v2916_v59  ;;  %v3003_v58 = vld [vmem:[%s4170_s1 + $0x52c] ss:$16 sps:$4 sm:$0xff]   ;;  %v2998_v59 = vld [vmem:[%s4170_s1 + $0x540] ss:$16 sps:$4 sm:$0xff]  }
  0x71   :  { %1477 = vmatprep.subr.bf16.mxu1 %v2919_v60  ;;  %v3001_v60 = vld [vmem:[%s4170_s1 + $0x528] ss:$16 sps:$4 sm:$0xff]  }
  0x73   :  { %1316 = vmatpush1.bf16.msra.mxu0 %v2914_v61  ;;  %v3006_v61 = vld [vmem:[%s4170_s1 + $0x564] ss:$16 sps:$4 sm:$0xff]  }
  0x74   :  { %1478 = vmatpush1.bf16.msra.mxu1 %v2917_v62  ;;  %1317 = vmatprep.subr.bf16.mxu0 %v2922_v63  ;;  %v3009_v62 = vld [vmem:[%s4170_s1 + $0x54c] ss:$16 sps:$4 sm:$0xff]   ;;  %v3004_v63 = vld [vmem:[%s4170_s1 + $0x560] ss:$16 sps:$4 sm:$0xff]  }
  0x75   :  { %1479 = vmatprep.subr.bf16.mxu1 %v2925_v0  ;;  %v3007_v0 = vld [vmem:[%s4170_s1 + $0x548] ss:$16 sps:$4 sm:$0xff]  }
  0x77   :  { %1318 = vmatpush1.bf16.msra.mxu0 %v2920_v1  ;;  %v3012_v1 = vld [vmem:[%s4170_s1 + $0x584] ss:$16 sps:$4 sm:$0xff]  }
  0x78   :  { %1480 = vmatpush1.bf16.msra.mxu1 %v2923_v3  ;;  %1319 = vmatprep.subr.bf16.mxu0 %v2928_v4  ;;  %v3015_v3 = vld [vmem:[%s4170_s1 + $0x56c] ss:$16 sps:$4 sm:$0xff]   ;;  %v3010_v4 = vld [vmem:[%s4170_s1 + $0x580] ss:$16 sps:$4 sm:$0xff]  }
  0x79   :  { %1481 = vmatprep.subr.bf16.mxu1 %v2931_v5  ;;  %v3013_v5 = vld [vmem:[%s4170_s1 + $0x568] ss:$16 sps:$4 sm:$0xff]  }
  0x7b   :  { %1320 = vmatpush1.bf16.msra.mxu0 %v2926_v6  ;;  %v3018_v6 = vld [vmem:[%s4170_s1 + $0x5a4] ss:$16 sps:$4 sm:$0xff]  }
  0x7c   :  { %1482 = vmatpush1.bf16.msra.mxu1 %v2929_v7  ;;  %1321 = vmatprep.subr.bf16.mxu0 %v2934_v8  ;;  %v3021_v7 = vld [vmem:[%s4170_s1 + $0x58c] ss:$16 sps:$4 sm:$0xff]   ;;  %v3016_v8 = vld [vmem:[%s4170_s1 + $0x5a0] ss:$16 sps:$4 sm:$0xff]  }
  0x7d   :  { %1483 = vmatprep.subr.bf16.mxu1 %v2937_v9 }
  0x7f   :  { %1322 = vmatpush1.bf16.msra.mxu0 %v2932_v11 }
  0x80   :  { %1484 = vmatpush1.bf16.msra.mxu1 %v2935_v13  ;;  %1332 = vmatprep.subr.bf16.mxu0 %v2940_v14 }
  0x81   :  { %1485 = vmatprep.subr.bf16.mxu1 %v2943_v15 }
  0x82   :  { %1324 = vmatmul.mubr.bf16.vlgmr.msra.gmra.mrb[0].mxu0 %v43_v16 }
  0x83   :  { %1333 = vmatpush1.bf16.msra.mxu0 %v2938_v17  ;;  %1364 = vmatprep.mubr.bf16.mxu0 %v46_v22 }
  0x84   :  { %1486 = vmatpush1.bf16.msra.mxu1 %v2941_v18  ;;  %1334 = vmatprep.subr.bf16.mxu0 %v2946_v19 }
  0x85   :  { %1496 = vmatprep.subr.bf16.mxu1 %v2949_v21 }
  0x87   :  { %1335 = vmatpush1.bf16.msra.mxu0 %v2944_v23  ;;  %1488 = vmatmul.mubr.bf16.vlgmr.msra.gmra.mrb[4].mxu1 %v43_v16 }
  0x88   :  { %1497 = vmatpush1.bf16.msra.mxu1 %v2947_v24  ;;  %1336 = vmatprep.subr.bf16.mxu0 %v2952_v25 }
  0x89   :  { %1498 = vmatprep.subr.bf16.mxu1 %v2955_v26  ;;  %1528 = vmatprep.mubr.bf16.mxu1 %v46_v22 }
  0x8b   :  { %1337 = vmatpush1.bf16.msra.mxu0 %v2950_v27 }
  0x8c   :  { %1499 = vmatpush1.bf16.msra.mxu1 %v2953_v28  ;;  %1338 = vmatprep.subr.bf16.mxu0 %v2958_v29 }
  0x8d   :  { %1500 = vmatprep.subr.bf16.mxu1 %v2961_v30 }
  0x8f   :  { %1339 = vmatpush1.bf16.msra.mxu0 %v2956_v31 }
  0x90   :  { %1501 = vmatpush1.bf16.msra.mxu1 %v2959_v32  ;;  %1340 = vmatprep.subr.bf16.mxu0 %v2964_v33 }
  0x91   :  { %1502 = vmatprep.subr.bf16.mxu1 %v2967_v34 }
  0x93   :  { %1341 = vmatpush1.bf16.msra.mxu0 %v2962_v35 }
  0x94   :  { %1503 = vmatpush1.bf16.msra.mxu1 %v2965_v36  ;;  %1342 = vmatprep.subr.bf16.mxu0 %v2970_v37 }
  0x95   :  { %1504 = vmatprep.subr.bf16.mxu1 %v2973_v38 }
  0x97   :  { %1343 = vmatpush1.bf16.msra.mxu0 %v2968_v39 }
  0x98   :  { %1505 = vmatpush1.bf16.msra.mxu1 %v2971_v40  ;;  %1344 = vmatprep.subr.bf16.mxu0 %v2976_v41 }
  0x99   :  { %1506 = vmatprep.subr.bf16.mxu1 %v2979_v42 }
  0x9b   :  { %1345 = vmatpush1.bf16.msra.mxu0 %v2974_v43 }
  0x9c   :  { %1507 = vmatpush1.bf16.msra.mxu1 %v2977_v44  ;;  %1346 = vmatprep.subr.bf16.mxu0 %v2982_v45 }
  0x9d   :  { %1508 = vmatprep.subr.bf16.mxu1 %v2985_v46 }
  0x9f   :  { %1347 = vmatpush1.bf16.msra.mxu0 %v2980_v47 }
  0xa0   :  { %1509 = vmatpush1.bf16.msra.mxu1 %v2983_v48  ;;  %1348 = vmatprep.subr.bf16.mxu0 %v2988_v49 }
  0xa1   :  { %1510 = vmatprep.subr.bf16.mxu1 %v2991_v50 }
  0xa3   :  { %1349 = vmatpush1.bf16.msra.mxu0 %v2986_v51 }
  0xa4   :  { %1511 = vmatpush1.bf16.msra.mxu1 %v2989_v52  ;;  %1350 = vmatprep.subr.bf16.mxu0 %v2994_v53 }
  0xa5   :  { %1512 = vmatprep.subr.bf16.mxu1 %v2997_v54 }
  0xa7   :  { %1351 = vmatpush1.bf16.msra.mxu0 %v2992_v55 }
  0xa8   :  { %1513 = vmatpush1.bf16.msra.mxu1 %v2995_v56  ;;  %1352 = vmatprep.subr.bf16.mxu0 %v3000_v57 }
  0xa9   :  { %1514 = vmatprep.subr.bf16.mxu1 %v3003_v58 }
  0xab   :  { %1353 = vmatpush1.bf16.msra.mxu0 %v2998_v59 }
  0xac   :  { %1515 = vmatpush1.bf16.msra.mxu1 %v3001_v60  ;;  %1354 = vmatprep.subr.bf16.mxu0 %v3006_v61 }
  0xad   :  { %1516 = vmatprep.subr.bf16.mxu1 %v3009_v62 }
  0xaf   :  { %1355 = vmatpush1.bf16.msra.mxu0 %v3004_v63 }
  0xb0   :  { %1517 = vmatpush1.bf16.msra.mxu1 %v3007_v0  ;;  %1356 = vmatprep.subr.bf16.mxu0 %v3012_v1 }
  0xb1   :  { %1518 = vmatprep.subr.bf16.mxu1 %v3015_v3 }
  0xb3   :  { %1357 = vmatpush1.bf16.msra.mxu0 %v3010_v4 }
  0xb4   :  { %14 = vsyncpa [#allocation3], 0  ;;  %1519 = vmatpush1.bf16.msra.mxu1 %v3013_v5  ;;  %1358 = vmatprep.subr.bf16.mxu0 %v3018_v6  ;;  %v3019_v9 = vld [vmem:[%s4170_s1 + $0x588] ss:$16 sps:$4 sm:$0xff]   ;;  %v3024_v11 = vld [vmem:[%s4170_s1 + $0x5c4] ss:$16 sps:$4 sm:$0xff]  }
  0xb5   :  { %1520 = vmatprep.subr.bf16.mxu1 %v3021_v7  ;;  %v3027_v12 = vld [vmem:[%s4170_s1 + $0x5ac] ss:$16 sps:$4 sm:$0xff]   ;;  %v3022_v13 = vld [vmem:[%s4170_s1 + $0x5c0] ss:$16 sps:$4 sm:$0xff]   ;;  %v3025_v14 = vld [vmem:[%s4170_s1 + $0x5a8] ss:$16 sps:$4 sm:$0xff]  }
  0xb6   :  { %v3030_v15 = vld [vmem:[%s4170_s1 + $0x5e4] ss:$16 sps:$4 sm:$0xff]   ;;  %v3033_v16 = vld [vmem:[%s4170_s1 + $0x5cc] ss:$16 sps:$4 sm:$0xff]   ;;  %v3028_v17 = vld [vmem:[%s4170_s1 + $0x5e0] ss:$16 sps:$4 sm:$0xff]  }
  0xb7   :  { %1359 = vmatpush1.bf16.msra.mxu0 %v3016_v8  ;;  %v38_v18 = vld [vmem:[%s4169_s0 + $0x20] sm:$0xff]  ;;  %v3031_v19 = vld [vmem:[%s4170_s1 + $0x5c8] ss:$16 sps:$4 sm:$0xff]   ;;  %v3036_v21 = vld [vmem:[%s4170_s1 + $0x5ec] ss:$16 sps:$4 sm:$0xff]   ;;  %vm3186_vm1 = vmmov 0  }
  0xb8   :  { %1521 = vmatpush1.bf16.msra.mxu1 %v3019_v9  ;;  %1360 = vmatprep.subr.bf16.mxu0 %v3024_v11  ;;  %v3042_v20 = vld [vmem:[%s4172_s3 + $0x4] ss:$8 sps:$4 sm:$0xff]   ;;  %v45_v22 = vpack.c.bf16 %v38_v18, %v38_v18  ;;  %v3040_v23 = vld [vmem:[%s4172_s3] ss:$8 sps:$4 sm:$0xff]   ;;  %v3045_v25 = vld [vmem:[%s4172_s3 + $0x14] ss:$8 sps:$4 sm:$0xff]   ;;  %v246_v9 = vlaneseq }
  0xb9   :  { %1522 = vmatprep.subr.bf16.mxu1 %v3027_v12  ;;  %v3034_v24 = vld [vmem:[%s4170_s1 + $0x5e8] ss:$16 sps:$4 sm:$0xff]   ;;  %v3039_v26 = vld [vmem:[%s4170_s1 + $0x60c] ss:$16 sps:$4 sm:$0xff]   ;;  %v3136_v60 = vld [vmem:[%s4174_s5 + $0x40] sm:$0xff]  }
  0xba   :  { %v3043_v27 = vld [vmem:[%s4172_s3 + $0x10] ss:$8 sps:$4 sm:$0xff]   ;;  %v3048_v29 = vld [vmem:[%s4172_s3 + $0x24] ss:$8 sps:$4 sm:$0xff]   ;;  %v3046_v30 = vld [vmem:[%s4172_s3 + $0x20] ss:$8 sps:$4 sm:$0xff]  }
  0xbb   :  { %1361 = vmatpush1.bf16.msra.mxu0 %v3022_v13  ;;  %v3037_v28 = vld [vmem:[%s4170_s1 + $0x608] ss:$16 sps:$4 sm:$0xff]   ;;  %v3051_v31 = vld [vmem:[%s4172_s3 + $0x34] ss:$8 sps:$4 sm:$0xff]   ;;  %v3054_v33 = vld [vmem:[%s4172_s3 + $0x44] ss:$8 sps:$4 sm:$0xff]  }
  0xbc   :  { %1523 = vmatpush1.bf16.msra.mxu1 %v3025_v14  ;;  %1362 = vmatprep.subr.bf16.mxu0 %v3030_v15  ;;  %v3049_v32 = vld [vmem:[%s4172_s3 + $0x30] ss:$8 sps:$4 sm:$0xff]   ;;  %v3057_v34 = vld [vmem:[%s4172_s3 + $0x54] ss:$8 sps:$4 sm:$0xff]   ;;  %v3060_v36 = vld [vmem:[%s4172_s3 + $0x64] ss:$8 sps:$4 sm:$0xff]  }
  0xbd   :  { %1524 = vmatprep.subr.bf16.mxu1 %v3033_v16  ;;  %v3055_v35 = vld [vmem:[%s4172_s3 + $0x50] ss:$8 sps:$4 sm:$0xff]   ;;  %v3058_v37 = vld [vmem:[%s4172_s3 + $0x60] ss:$8 sps:$4 sm:$0xff]   ;;  %v3066_v42 = vld [vmem:[%s4172_s3 + $0x84] ss:$8 sps:$4 sm:$0xff]  }
  0xbe   :  { %v3061_v40 = vld [vmem:[%s4172_s3 + $0x70] ss:$8 sps:$4 sm:$0xff]   ;;  %v3064_v44 = vld [vmem:[%s4172_s3 + $0x80] ss:$8 sps:$4 sm:$0xff]   ;;  %v3069_v45 = vld [vmem:[%s4172_s3 + $0x94] ss:$8 sps:$4 sm:$0xff]  }
  0xbf   :  { %1363 = vmatpush1.bf16.msra.mxu0 %v3028_v17  ;;  %v3067_v46 = vld [vmem:[%s4172_s3 + $0x90] ss:$8 sps:$4 sm:$0xff]   ;;  %v3072_v47 = vld [vmem:[%s4172_s3 + $0xa4] ss:$8 sps:$4 sm:$0xff]   ;;  %v3070_v48 = vld [vmem:[%s4172_s3 + $0xa0] ss:$8 sps:$4 sm:$0xff]  }
  0xc0   :  { %1525 = vmatpush1.bf16.msra.mxu1 %v3031_v19  ;;  %1982 = vmatprep.subr.bf16.mxu0 %v3042_v20  ;;  %v3075_v49 = vld [vmem:[%s4172_s3 + $0xb4] ss:$8 sps:$4 sm:$0xff]   ;;  %v3073_v50 = vld [vmem:[%s4172_s3 + $0xb0] ss:$8 sps:$4 sm:$0xff]   ;;  %v3078_v51 = vld [vmem:[%s4172_s3 + $0xc4] ss:$8 sps:$4 sm:$0xff]  }
  0xc1   :  { %1526 = vmatprep.subr.bf16.mxu1 %v3036_v21  ;;  %v3076_v52 = vld [vmem:[%s4172_s3 + $0xc0] ss:$8 sps:$4 sm:$0xff]   ;;  %v3081_v53 = vld [vmem:[%s4172_s3 + $0xd4] ss:$8 sps:$4 sm:$0xff]   ;;  %v3079_v54 = vld [vmem:[%s4172_s3 + $0xd0] ss:$8 sps:$4 sm:$0xff]  }
  0xc2   :  { %1365 = vmatmul.mubr.bf16.vlgmr.msra.gmra.mrb[0].mxu0 %v45_v22  ;;  %v3084_v55 = vld [vmem:[%s4172_s3 + $0xe4] ss:$8 sps:$4 sm:$0xff]   ;;  %v3082_v56 = vld [vmem:[%s4172_s3 + $0xe0] ss:$8 sps:$4 sm:$0xff]   ;;  %v3087_v57 = vld [vmem:[%s4172_s3 + $0xf4] ss:$8 sps:$4 sm:$0xff]  }
  0xc3   :  { %1983 = vmatpush1.bf16.msra.mxu0 %v3040_v23  ;;  %v3085_v58 = vld [vmem:[%s4172_s3 + $0xf0] ss:$8 sps:$4 sm:$0xff]   ;;  %v3090_v59 = vld [vmem:[%s4172_s3 + $0x104] ss:$8 sps:$4 sm:$0xff]   ;;  %v3994_v11 = vshrl.u32 %v246_v9, 7 }
  0xc4   :  { %1527 = vmatpush1.bf16.msra.mxu1 %v3034_v24  ;;  %1984 = vmatprep.subr.bf16.mxu0 %v3045_v25  ;;  %v3137_v61 = vld [vmem:[%s4174_s5] sm:$0xff]   ;;  %v3138_v62 = vld [vmem:[%s4174_s5 + $0x48] sm:$0xff]   ;;  %v3140_v0 = vld [vmem:[%s4174_s5 + $0x50] sm:$0xff]  }
  0xc5   :  { %1537 = vmatprep.subr.bf16.mxu1 %v3039_v26  ;;  %v3139_v63 = vld [vmem:[%s4174_s5 + $0x8] sm:$0xff]   ;;  %v3141_v1 = vld [vmem:[%s4174_s5 + $0x10] sm:$0xff]   ;;  %v3142_v3 = vld [vmem:[%s4174_s5 + $0x58] sm:$0xff]   ;;  %v248_v12 = vsub.s32 0, %v3994_v11  ;;  %v252_v14 = vsub.s32 1, %v3994_v11 }
  0xc6   :  { %v3143_v4 = vld [vmem:[%s4174_s5 + $0x18] sm:$0xff]   ;;  %v3144_v5 = vld [vmem:[%s4174_s5 + $0x60] sm:$0xff]   ;;  %v3146_v7 = vld [vmem:[%s4174_s5 + $0x68] sm:$0xff]  }
  0xc7   :  { %1529 = vmatmul.mubr.bf16.vlgmr.msra.gmra.mrb[4].mxu1 %v45_v22  ;;  %1985 = vmatpush1.bf16.msra.mxu0 %v3043_v27  ;;  %v3145_v6 = vld [vmem:[%s4174_s5 + $0x20] sm:$0xff]   ;;  %v3147_v8 = vld [vmem:[%s4174_s5 + $0x28] sm:$0xff]   ;;  %v3148_v9 = vld [vmem:[%s4174_s5 + $0x70] sm:$0xff]  }
  0xc8   :  { %1538 = vmatpush1.bf16.msra.mxu1 %v3037_v28  ;;  %1569 = vmatprep.mubr.bf16.mxu1 %v3184_v2  ;;  %v3052_v2 = vld [vmem:[%s4172_s3 + $0x40] ss:$8 sps:$4 sm:$0xff]  }
  0xc9   :  { %1986 = vmatprep.subr.bf16.mxu0 %v3048_v29  ;;  %2659 = vmatprep.subr.bf16.mxu1 %v3136_v60  ;;  %v4000_v13 = vld [vmem:[%s4171_s2] sm:$0xf] }
  0xca   :  { %v249_v15 = vrot.slane %v4000_v13, %v248_v12  ;;  %v253_v16 = vrot.slane %v4000_v13, %v252_v14  ;;  %v3088_v28 = vld [vmem:[%s4172_s3 + $0x100] ss:$8 sps:$4 sm:$0xff]  }
  0xcb   :  { %1987 = vmatpush1.bf16.msra.mxu0 %v3046_v30  ;;  %v3093_v30 = vld [vmem:[%s4172_s3 + $0x114] ss:$8 sps:$4 sm:$0xff]   ;;  %v3124_v60 = vld [vmem:[%s4172_s3 + $0x1c0] ss:$8 sps:$4 sm:$0xff]  }
  0xcc   :  { %1988 = vmatprep.subr.bf16.mxu0 %v3051_v31  ;;  %v260_v31 = vsub.s32 3, %v3994_v11 }
  0xcf   :  { %1989 = vmatpush1.bf16.msra.mxu0 %v3049_v32  ;;  %v3091_v32 = vld [vmem:[%s4172_s3 + $0x110] ss:$8 sps:$4 sm:$0xff]  }
  0xd0   :  { %1990 = vmatprep.subr.bf16.mxu0 %v3054_v33  ;;  %v3096_v33 = vld [vmem:[%s4172_s3 + $0x124] ss:$8 sps:$4 sm:$0xff]  }
  0xd3   :  { %2568 = vmatmul.mubr.msk.bf16.vlgmr.msra.gmra.mrb[4].mxu1 %vm1246_vm0, %v3266_v10  ;;  %1991 = vmatpush1.bf16.msra.mxu0 %v3052_v2  ;;  %v3063_v10 = vld [vmem:[%s4172_s3 + $0x74] ss:$8 sps:$4 sm:$0xff]   ;;  %v261_v2 = vrot.slane %v4000_v13, %v260_v31 }
  0xd4   :  { %1992 = vmatprep.subr.bf16.mxu0 %v3057_v34  ;;  %2660 = vmatpush3.bf16.msra.mxu1 %v3137_v61  ;;  %v3094_v34 = vld [vmem:[%s4172_s3 + $0x120] ss:$8 sps:$4 sm:$0xff]   ;;  %v256_v61 = vsub.s32 2, %v3994_v11 }
  0xd5   :  { %2661 = vmatprep.subr.bf16.mxu1 %v3138_v62  ;;  %v3129_v62 = vld [vmem:[%s4172_s3 + $0x1d4] ss:$8 sps:$4 sm:$0xff]   ;;  %v3153_v11 = vld [vmem:[%s4176_s7 + $0x8] sm:$0xff]  }
  0xd7   :  { %1993 = vmatpush1.bf16.msra.mxu0 %v3055_v35 }
  0xd8   :  { %1994 = vmatprep.subr.bf16.mxu0 %v3060_v36  ;;  %2662 = vmatpush3.bf16.msra.mxu1 %v3139_v63  ;;  %v3099_v36 = vld [vmem:[%s4172_s3 + $0x134] ss:$8 sps:$4 sm:$0xff]   ;;  %v3127_v63 = vld [vmem:[%s4172_s3 + $0x1d0] ss:$8 sps:$4 sm:$0xff]  }
  0xd9   :  { %2663 = vmatprep.subr.bf16.mxu1 %v3140_v0  ;;  %v257_v0 = vrot.slane %v4000_v13, %v256_v61  ;;  %v3149_v13 = vld [vmem:[%s4174_s5 + $0x30] sm:$0xff]  }
  0xda   :  { %v3900_v38 = vpop.f32.mrb[0].mxu1 }
  0xdb   :  { %v3902_v39 = vpop.f32.mrb[1].mxu1  ;;  %1995 = vmatpush1.bf16.msra.mxu0 %v3058_v37 }
  0xdc   :  { %v1411_v41 = vpop.f32.mrb[2].mxu1  ;;  %1996 = vmatprep.subr.bf16.mxu0 %v3063_v10  ;;  %2664 = vmatpush3.bf16.msra.mxu1 %v3141_v1  ;;  %v3132_v1 = vld [vmem:[%s4172_s3 + $0x1e4] ss:$8 sps:$4 sm:$0xff]  }
  0xdd   :  { %v1412_v43 = vpop.f32.mrb[3].mxu1  ;;  %2665 = vmatprep.subr.bf16.mxu1 %v3142_v3  ;;  %v3130_v3 = vld [vmem:[%s4172_s3 + $0x1e0] ss:$8 sps:$4 sm:$0xff]  }
  0xdf   :  { %1997 = vmatpush1.bf16.msra.mxu0 %v3061_v40  ;;  %v3097_v40 = vld [vmem:[%s4172_s3 + $0x130] ss:$8 sps:$4 sm:$0xff]  }
  0xe0   :  { %1998 = vmatprep.subr.bf16.mxu0 %v3066_v42  ;;  %2666 = vmatpush3.bf16.msra.mxu1 %v3143_v4  ;;  %v3102_v42 = vld [vmem:[%s4172_s3 + $0x144] ss:$8 sps:$4 sm:$0xff]  }
  0xe1   :  { %2667 = vmatprep.subr.bf16.mxu1 %v3144_v5  ;;  %v3135_v5 = vld [vmem:[%s4172_s3 + $0x1f4] ss:$8 sps:$4 sm:$0xff]  }
  0xe3   :  { %1999 = vmatpush1.bf16.msra.mxu0 %v3064_v44  ;;  %v3100_v44 = vld [vmem:[%s4172_s3 + $0x140] ss:$8 sps:$4 sm:$0xff]  }
  0xe4   :  { %2000 = vmatprep.subr.bf16.mxu0 %v3069_v45  ;;  %2668 = vmatpush3.bf16.msra.mxu1 %v3145_v6  ;;  %v3105_v45 = vld [vmem:[%s4172_s3 + $0x154] ss:$8 sps:$4 sm:$0xff]   ;;  %v3133_v6 = vld [vmem:[%s4172_s3 + $0x1f0] ss:$8 sps:$4 sm:$0xff]  }
  0xe5   :  { %2669 = vmatprep.subr.bf16.mxu1 %v3146_v7 }
  0xe7   :  { %2001 = vmatpush1.bf16.msra.mxu0 %v3067_v46  ;;  %v3103_v46 = vld [vmem:[%s4172_s3 + $0x150] ss:$8 sps:$4 sm:$0xff]  }
  0xe8   :  { %2002 = vmatprep.subr.bf16.mxu0 %v3072_v47  ;;  %2670 = vmatpush3.bf16.msra.mxu1 %v3147_v8  ;;  %v3108_v47 = vld [vmem:[%s4172_s3 + $0x164] ss:$8 sps:$4 sm:$0xff]  }
  0xe9   :  { %2671 = vmatprep.subr.bf16.mxu1 %v3148_v9 }
  0xeb   :  { %2003 = vmatpush1.bf16.msra.mxu0 %v3070_v48  ;;  %v3106_v48 = vld [vmem:[%s4172_s3 + $0x160] ss:$8 sps:$4 sm:$0xff]  }
  0xec   :  { %2004 = vmatprep.subr.bf16.mxu0 %v3075_v49  ;;  %v3111_v49 = vld [vmem:[%s4172_s3 + $0x174] ss:$8 sps:$4 sm:$0xff]   ;;  %2672 = vmatpush3.bf16.msra.mxu1 %v3149_v13 }
  0xef   :  { %2005 = vmatpush1.bf16.msra.mxu0 %v3073_v50  ;;  %v3109_v50 = vld [vmem:[%s4172_s3 + $0x170] ss:$8 sps:$4 sm:$0xff]  }
  0xf0   :  { %2006 = vmatprep.subr.bf16.mxu0 %v3078_v51  ;;  %v3114_v51 = vld [vmem:[%s4172_s3 + $0x184] ss:$8 sps:$4 sm:$0xff]  }
  0xf3   :  { %2007 = vmatpush1.bf16.msra.mxu0 %v3076_v52  ;;  %v3112_v52 = vld [vmem:[%s4172_s3 + $0x180] ss:$8 sps:$4 sm:$0xff]  }
  0xf4   :  { %2008 = vmatprep.subr.bf16.mxu0 %v3081_v53  ;;  %v3117_v53 = vld [vmem:[%s4172_s3 + $0x194] ss:$8 sps:$4 sm:$0xff]  }
  0xf7   :  { %2009 = vmatpush1.bf16.msra.mxu0 %v3079_v54  ;;  %v3115_v54 = vld [vmem:[%s4172_s3 + $0x190] ss:$8 sps:$4 sm:$0xff]  }
  0xf8   :  { %2010 = vmatprep.subr.bf16.mxu0 %v3084_v55  ;;  %v3120_v55 = vld [vmem:[%s4172_s3 + $0x1a4] ss:$8 sps:$4 sm:$0xff]  }
  0xfb   :  { %2011 = vmatpush1.bf16.msra.mxu0 %v3082_v56  ;;  %v3118_v56 = vld [vmem:[%s4172_s3 + $0x1a0] ss:$8 sps:$4 sm:$0xff]  }
  0xfc   :  { %2012 = vmatprep.subr.bf16.mxu0 %v3087_v57  ;;  %v3123_v57 = vld [vmem:[%s4172_s3 + $0x1b4] ss:$8 sps:$4 sm:$0xff]  }
  0xff   :  { %2013 = vmatpush1.bf16.msra.mxu0 %v3085_v58  ;;  %v3121_v58 = vld [vmem:[%s4172_s3 + $0x1b0] ss:$8 sps:$4 sm:$0xff]  }
 0x100   :  { %2023 = vmatprep.subr.bf16.mxu0 %v3090_v59  ;;  %v3126_v59 = vld [vmem:[%s4172_s3 + $0x1c4] ss:$8 sps:$4 sm:$0xff]  }
 0x195   :  { %v1366_v17 = vpop.f32.mrb[0].mxu0 }
 0x196   :  { %v2710_v18 = vadd.f32 %v1366_v17, %v249_v15  ;;  %v1368_v19 = vpop.f32.mrb[1].mxu0  ;;  %v3150_v15 = vld [vmem:[%s4174_s5 + $0x78] sm:$0xff]   ;;  %v3185_v17 = vmov 0.0  }
 0x197   :  { %v2712_v20 = vadd.f32 %v1368_v19, %v253_v16  ;;  %v1370_v21 = vpop.f32.mrb[2].mxu0  ;;  %v3151_v16 = vld [vmem:[%s4174_s5 + $0x38] sm:$0xff]   ;;  %2673 = vmatprep.subr.bf16.mxu1 %v3150_v15 }
 0x198   :  { %v2711_v22 = vadd.f32 %v2710_v18, %v3900_v38  ;;  %v1371_v23 = vpop.f32.mrb[3].mxu0  ;;  %2674 = vmatpush3.bf16.msra.mxu1 %v3151_v16  ;;  %v1650_v18 = vld [vmem:[%s4173_s4] sm:$0x3] }
 0x199   :  { %v2713_v24 = vadd.f32 %v2712_v20, %v3902_v39  ;;  %2690 = vmatprep.subr.bf16.mxu1 %v3185_v17  ;;  %v1655_v19 = vrot.slane %v1650_v18, %v248_v12  ;;  %v1659_v20 = vrot.slane %v1650_v18, %v252_v14  ;;  %v3154_v12 = vld [vmem:[%s4176_s7 + $0x10] sm:$0xff]   ;;  %v3155_v14 = vld [vmem:[%s4176_s7 + $0x18] sm:$0xff]  }
 0x19a   :  { %v1578_v25 = vmax.f32 %v2711_v22, 0.0 }
 0x19b   :  { %v1579_v26 = vmax.f32 %v2713_v24, 0.0 }
 0x19c   :  { %v1582_v29 = vpack.c.bf16 %v1578_v25, %v1578_v25 }
 0x19d   :  { %v1583_v27 = vpack.c.bf16 %v1579_v26, %v1579_v26 }
 0x19f   :  { %2014 = vmatprep.mubr.bf16.mxu0 %v1583_v27 }
 0x1a0   :  { %2015 = vmatmul.mubr.bf16.vlgmr.msra.gmra.mrb[4].mxu0 %v1582_v29 }
 0x1a1   :  { %2024 = vmatpush1.bf16.msra.mxu0 %v3088_v28 }
 0x1a2   :  { %2025 = vmatprep.subr.bf16.mxu0 %v3093_v30  ;;  %v3152_v30 = vld [vmem:[%s4176_s7] sm:$0xff]  }
 0x1a5   :  { %2026 = vmatpush1.bf16.msra.mxu0 %v3091_v32  ;;  %v3156_v32 = vld [vmem:[%s4176_s7 + $0x20] sm:$0xff]  }
 0x1a6   :  { %v1571_v35 = vpop.f32.mrb[4].mxu1  ;;  %2027 = vmatprep.subr.bf16.mxu0 %v3096_v33  ;;  %v3157_v33 = vld [vmem:[%s4176_s7 + $0x28] sm:$0xff]  }
 0x1a7   :  { %v1573_v37 = vpop.f32.mrb[5].mxu1  ;;  %v2714_v4 = vadd.f32 %v1571_v35, %v257_v0 }
 0x1a8   :  { %v2715_v10 = vadd.f32 %v1573_v37, %v261_v2  ;;  %v1575_v38 = vpop.f32.mrb[6].mxu1  ;;  %v3158_v2 = vld [vmem:[%s4176_s7 + $0x30] sm:$0xff]  }
 0x1a9   :  { %v1576_v39 = vpop.f32.mrb[7].mxu1  ;;  %2028 = vmatpush1.bf16.msra.mxu0 %v3094_v34  ;;  %v1580_v7 = vmax.f32 %v2714_v4, 0.0  ;;  %v3159_v34 = vld [vmem:[%s4176_s7 + $0x38] sm:$0xff]   ;;  %s3187_s7 = smov [#allocation2]  }
 0x1aa   :  { %v1581_v41 = vmax.f32 %v2715_v10, 0.0  ;;  %2029 = vmatprep.subr.bf16.mxu0 %v3099_v36  ;;  %v2633_v36 = vld [vmem:[%s4175_s6] ss:$0 sm:$0xff]  ;;  %s2363_s30 = sshll.u32 %s3187_s7, 4  ;;  %s2364_s30 = int_to_ptr.vmem [resolvable:$true] %s2363_s30 }
 0x1ab   :  { %v1584_v8 = vpack.c.bf16 %v1580_v7, %v1580_v7  ;;  %s3160_s6 = scalar_lea.vmem %s2364_s30, 128  ;;  %p3165_p1 = scmp.lt.s32.totalorder %s2364_s30, %s2364_s30 }
 0x1ac   :  { %v1585_v43 = vpack.c.bf16 %v1581_v41, %v1581_v41  ;;  %p3161_p0 = scmp.ne.s32.totalorder %s2364_s30, %s3160_s6  ;;  %p3166_p2 = scmp.lt.s32.totalorder %s3160_s6, %s3160_s6 }
 0x1ad   :  { %2030 = vmatpush1.bf16.msra.mxu0 %v3097_v40 }
 0x1ae   :  { %2055 = vmatprep.mubr.bf16.mxu0 %v1585_v43  ;;  %2031 = vmatprep.subr.bf16.mxu0 %v3102_v42  ;;  %v2650_v43 = vld [vmem:[%s4177_s8] ss:$0 sm:$0xff]  ;;  %p3167_p3 = por %p3166_p2, %p3165_p1 }
 0x1b0   :  { %p3168_p4 = pnand %p3167_p3, %p3161_p0 }
 0x1b1   :  { %2032 = vmatpush1.bf16.msra.mxu0 %v3100_v44 }
 0x1b2   :  { %2033 = vmatprep.subr.bf16.mxu0 %v3105_v45 }
 0x1b5   :  { %2034 = vmatpush1.bf16.msra.mxu0 %v3103_v46 }
 0x1b6   :  { %2035 = vmatprep.subr.bf16.mxu0 %v3108_v47 }
 0x1b9   :  { %2036 = vmatpush1.bf16.msra.mxu0 %v3106_v48 }
 0x1ba   :  { %2037 = vmatprep.subr.bf16.mxu0 %v3111_v49 }
 0x1bd   :  { %2038 = vmatpush1.bf16.msra.mxu0 %v3109_v50 }
 0x1be   :  { %2039 = vmatprep.subr.bf16.mxu0 %v3114_v51 }
 0x1c1   :  { %2040 = vmatpush1.bf16.msra.mxu0 %v3112_v52 }
 0x1c2   :  { %2041 = vmatprep.subr.bf16.mxu0 %v3117_v53 }
 0x1c5   :  { %2042 = vmatpush1.bf16.msra.mxu0 %v3115_v54 }
 0x1c6   :  { %2043 = vmatprep.subr.bf16.mxu0 %v3120_v55 }
 0x1c9   :  { %2044 = vmatpush1.bf16.msra.mxu0 %v3118_v56 }
 0x1ca   :  { %2045 = vmatprep.subr.bf16.mxu0 %v3123_v57 }
 0x1cd   :  { %2046 = vmatpush1.bf16.msra.mxu0 %v3121_v58 }
 0x1ce   :  { %2047 = vmatprep.subr.bf16.mxu0 %v3126_v59 }
 0x1d1   :  { %2048 = vmatpush1.bf16.msra.mxu0 %v3124_v60 }
 0x1d2   :  { %2049 = vmatprep.subr.bf16.mxu0 %v3129_v62 }
 0x1d5   :  { %2050 = vmatpush1.bf16.msra.mxu0 %v3127_v63 }
 0x1d6   :  { %2051 = vmatprep.subr.bf16.mxu0 %v3132_v1 }
 0x1d9   :  { %2052 = vmatpush1.bf16.msra.mxu0 %v3130_v3 }
 0x1da   :  { %2053 = vmatprep.subr.bf16.mxu0 %v3135_v5 }
 0x1dd   :  { %2054 = vmatpush1.bf16.msra.mxu0 %v3133_v6 }
 0x1e0   :  { %2056 = vmatmul.mubr.bf16.vlgmr.msra.gmra.mrb[4].mxu0 %v1584_v8 }
 0x2b3   :  { %v2057_v21 = vpop.f32.mrb[4].mxu0 }
 0x2b4   :  { %v2716_v22 = vadd.f32 %v2057_v21, %v1655_v19  ;;  %v2059_v23 = vpop.f32.mrb[5].mxu0 }
 0x2b5   :  { %v2717_v24 = vadd.f32 %v2059_v23, %v1659_v20  ;;  %v2061_v25 = vpop.f32.mrb[6].mxu0 }
 0x2b6   :  { %v2064_v26 = vmax.f32 %v2716_v22, 0.0  ;;  %v2062_v27 = vpop.f32.mrb[7].mxu0 }
 0x2b7   :  { %v2065_v28 = vmax.f32 %v2717_v24, 0.0 }
 0x2b8   :  { %v2066_v31 = vpack.c.bf16 %v2064_v26, %v2064_v26 }
 0x2b9   :  { %v2067_v29 = vpack.c.bf16 %v2065_v28, %v2065_v28 }
 0x2bb   :  { %2235 = vmatprep.mubr.bf16.mxu1 %v2067_v29 }
 0x2bc   :  { %2236 = vmatmul.mubr.bf16.vlgmr.msra.gmra.mrb[8].mxu1 %v2066_v31 }
 0x2bd   :  { %2691 = vmatpush3.bf16.msra.mxu1 %v3152_v30  ;;  %2706 = vmatprep.mubr.msk.bf16.mxu1 %vm3186_vm1, %v3185_v17 }
 0x2be   :  { %2692 = vmatprep.subr.bf16.mxu1 %v3185_v17 }
 0x2c1   :  { %2693 = vmatpush3.bf16.msra.mxu1 %v3153_v11 }
 0x2c2   :  { %2694 = vmatprep.subr.bf16.mxu1 %v3185_v17 }
 0x2c5   :  { %2695 = vmatpush3.bf16.msra.mxu1 %v3154_v12 }
 0x2c6   :  { %2696 = vmatprep.subr.bf16.mxu1 %v3185_v17 }
 0x2c9   :  { %2697 = vmatpush3.bf16.msra.mxu1 %v3155_v14 }
 0x2ca   :  { %2698 = vmatprep.subr.bf16.mxu1 %v3185_v17 }
 0x2cd   :  { %2699 = vmatpush3.bf16.msra.mxu1 %v3156_v32 }
 0x2ce   :  { %2700 = vmatprep.subr.bf16.mxu1 %v3185_v17 }
 0x2d1   :  { %2701 = vmatpush3.bf16.msra.mxu1 %v3157_v33 }
 0x2d2   :  { %2702 = vmatprep.subr.bf16.mxu1 %v3185_v17 }
 0x2d5   :  { %2703 = vmatpush3.bf16.msra.mxu1 %v3158_v2 }
 0x2d6   :  { %2704 = vmatprep.subr.bf16.mxu1 %v3185_v17 }
 0x2d9   :  { %2705 = vmatpush3.bf16.msra.mxu1 %v3159_v34 }
 0x38f   :  { %v2675_v35 = vpop.f32.mrb[8].mxu1 }
 0x390   :  { %v2676_v37 = vpop.f32.mrb[9].mxu1 }
 0x391   :  { %v2677_v10 = vadd.f32 %v2676_v37, %v2675_v35  ;;  %v2678_v38 = vpop.f32.mrb[10].mxu1 }
 0x392   :  { %v2679_v39 = vpop.f32.mrb[11].mxu1 }
 0x393   :  { %v2238_v40 = vadd.f32 %v2677_v10, %v2633_v36 }
 0x395   :  { %v2243_v41 = vmax.f32 %v2238_v40, 0.0 }
 0x397   :  { %v2244_v42 = vpack.c.bf16 %v2243_v41, %v2243_v41 }
 0x399   :  { %2707 = vmatmul.mubr.bf16.vlgmr.msra.gmra.mrb[12].mxu1 %v2244_v42 }
 0x46c   :  { %v2350_v44 = vpop.f32.mrb[12].mxu1 }
 0x46d   :  { %v2351_v45 = vadd.f32 %v2650_v43, %v2350_v44  ;;  %v2708_v46 = vpop.f32.mrb[13].mxu1 }
 0x46e   :  { %v2353_v47 = vpop.f32.mrb[14].mxu1 }
 0x46f   :  { %2356 = vst [vmem:[#allocation2] sm:$0xff] %v2351_v45  ;;  %v2709_v48 = vpop.f32.mrb[15].mxu1 }
 0x470   :  { %3171 = shalt.err (!%p3168_p4)
}
 0x471   :  { %s3172_s8 = scalar_lea.hbm %s4178_s9, 128 }
 0x472   :  { %p3173_p5 = scmp.ne.s32.totalorder %s4178_s9, %s3172_s8  ;;  %p3176_p6 = scmp.lt.u32.totalorder %s3172_s8, %s4178_s9 }
 0x474   :  { %p3178_p7 = pnand %p3176_p6, %p3173_p5 }
 0x476   :  { %3181 = shalt.err (!%p3178_p7)
}
 0x477   :  { %2366 = dma.vmem_to_hbm [thread:$0]  %s2364_s30, 128, %s4178_s9, [#allocation3]  }
 0x478   :  { %3182 = dma.done.wait [#allocation3], 128  }
 0x479   :  { %3183 = vsyncadd [#allocation3], 4294967168 }
 0x47a   :  { %2370 = vsyncpa [#allocation3], 1 }

</bundles_post_ra>
